<compile_context>
chip_gen: v7x
topology: tpu7x:2x2x1
jax: 0.10.0
libtpu: 0.0.40
codegen_flags: <defaults>
</compile_context>

<pallas_src>
import functools
import math

import jax
import jax.numpy as jnp
from jax.experimental import pallas as pl
from jax.experimental.pallas import tpu as pltpu

_INV_SQRT2 = 1.0 / math.sqrt(2.0)


def _round_up(x, m):
    return (x + m - 1) // m * m


# ----------------------------------------------------------------------------
# Per-TensorCore VMEM budget, queried once (conservative 64 MiB fallback so the
# tiling is valid on every generation, incl. v7x).
# ----------------------------------------------------------------------------
_VMEM_BUDGET_CACHE = None


def _vmem_budget_bytes():
    global _VMEM_BUDGET_CACHE
    if _VMEM_BUDGET_CACHE is None:
        cap = 64 * 1024 * 1024
        try:
            info = pltpu.get_tpu_info()
            cap = int(getattr(info, "vmem_capacity_bytes", cap)) or cap
        except Exception:
            pass
        # Leave headroom for compiler-internal scratch; stay below physical
        # VMEM even on the 128 MiB parts (v5e / v6e).
        _VMEM_BUDGET_CACHE = min(int(cap * 0.85), 112 * 1024 * 1024)
    return _VMEM_BUDGET_CACHE


def _choose_tiles(m_pad, c_pad, h_pad, in_item, out_item, use_acc_scratch,
                  budget, tile_m, tile_h):
    """Pick (tm, th) fitting the VMEM budget (double-buffered blocks)."""

    def fits(tm, th):
        fp = 2 * tm * c_pad * in_item                 # x rows (double-buffered)
        fp += 2 * c_pad * th * in_item                # w1 block
        fp += 2 * th * c_pad * in_item                # w2 block
        fp += 2 * 8 * th * 4 + 2 * 8 * c_pad * 4      # biases (sublane padded)
        fp += 2 * tm * c_pad * out_item               # output rows
        if use_acc_scratch:
            fp += tm * c_pad * 4                      # f32 accumulator scratch
        fp += 2 * tm * th * 4                         # f32 GELU intermediates
        return fp <= budget

    if tile_m is not None:
        tm_cands = [max(8, min(_round_up(tile_m, 8), m_pad))]
    else:
        tm_cands = []
        if m_pad <= 1024:
            tm_cands.append(m_pad)
        tm_cands += [t for t in (1024, 512, 256, 128, 64, 32, 16, 8)
                     if t <= min(m_pad, 1024)]
        tm_cands = list(dict.fromkeys(tm_cands))

    if tile_h is not None:
        assert tile_h % 128 == 0 and h_pad % tile_h == 0, (
            "tile_h must be a multiple of 128 that divides the padded hidden dim")
        th_resident = [tile_h]
        th_stream = [tile_h]
    else:
        th_resident = [h_pad]
        th_stream = [t for t in (512, 256, 128) if t < h_pad and h_pad % t == 0]
        if not th_stream:
            th_stream = [h_pad]

    # Pass 1: whole hidden dim in one tile -> weight block indices constant
    # across grid steps (fetched once, no re-streaming, no cross-step acc).
    min_tm = 0 if tile_m is not None else min(256, m_pad)
    for th in th_resident:
        for tm in tm_cands:
            if tm >= min_tm and fits(tm, th):
                return tm, th

    # Pass 2: stream weights over an H axis; prefer the largest row tile
    # (weight HBM traffic scales with the row-tile count, not with th).
    for tm in tm_cands:
        for th in th_stream:
            if fits(tm, th):
                return tm, th

    # Fallback: smallest legal tiles; let the compiler try.
    return tm_cands[-1], th_stream[-1]


def _mlp_kernel(x_ref, w1_ref, b1_ref, w2_ref, b2_ref, o_ref, *scratch,
                acc_in_output, approximate_gelu):
    """One (row-tile, hidden-tile) grid step.

    x_ref  : (TM, Cp)   input rows (resident across the H axis)
    w1_ref : (Cp, TH)   fc1 weight block
    b1_ref : (1,  TH)   fc1 bias block (f32)
    w2_ref : (TH, Cp)   fc2 weight block
    b2_ref : (1,  Cp)   fc2 bias (f32, full)
    o_ref  : (TM, Cp)   output rows (same block across H -> accumulator if f32)
    scratch: optional (TM, Cp) f32 accumulator (only for non-f32 outputs)
    """
    acc_ref = o_ref if acc_in_output else scratch[0]
    h_id = pl.program_id(1)

    # fc1 partial: MXU matmul in the compute dtype, f32 accumulation.
    h = jnp.dot(x_ref[...], w1_ref[...], preferred_element_type=jnp.float32)
    h = h + b1_ref[...]

    # GELU in f32.  Exact erf matches torch.nn.GELU(); the tanh approximation
    # routes through the otherwise-idle EUP slot (set approximate_gelu=True
    # when the VALU erf polynomial becomes the binding slot on v6e/v7x).
    if approximate_gelu:
        g = jax.nn.gelu(h, approximate=True)
    else:
        g = 0.5 * h * (1.0 + jax.lax.erf(h * _INV_SQRT2))

    # fc2 partial contribution of this hidden tile.
    partial = jnp.dot(g.astype(w2_ref.dtype), w2_ref[...],
                      preferred_element_type=jnp.float32)

    # Initialize with the first partial (+ fc2 bias) instead of zero-fill + add:
    # saves a full (TM, Cp) f32 store and a read-add pass per row tile.
    @pl.when(h_id == 0)
    def _():
        acc_ref[...] = partial + b2_ref[...]

    @pl.when(h_id > 0)
    def _():
        acc_ref[...] = acc_ref[...] + partial

    if not acc_in_output:
        @pl.when(h_id == pl.num_programs(1) - 1)
        def _():
            o_ref[...] = acc_ref[...].astype(o_ref.dtype)
    # TODO(synk): dropout is identity here (eval mode); no RNG mask applied.


def prepare_mlp_params(w1, b1, w2, b2, compute_dtype=jnp.bfloat16):
    """Pad (lane-aligned, zero) and cast the Mlp weights once, outside the hot path.

    w1: (C, H) fc1 weight in (in, out) layout (torch weight transposed)
    b1: (H,)   fc1 bias
    w2: (H, C) fc2 weight in (in, out) layout
    b2: (C,)   fc2 bias
    compute_dtype: MXU operand dtype (bf16 default; bias/GELU/accum stay f32).
    """
    C, H = w1.shape
    assert w2.shape == (H, C) and b1.shape == (H,) and b2.shape == (C,)
    c_pad = _round_up(C, 128)
    h_pad = _round_up(H, 128)
    # Zero padding is exact: padded hidden units have zero weight+bias so
    # gelu(0) == 0; padded output columns are sliced off after the kernel.
    w1p = jnp.pad(w1.astype(compute_dtype), ((0, c_pad - C), (0, h_pad - H)))
    w2p = jnp.pad(w2.astype(compute_dtype), ((0, h_pad - H), (0, c_pad - C)))
    b1p = jnp.pad(b1.astype(jnp.float32).reshape(1, H), ((0, 0), (0, h_pad - H)))
    b2p = jnp.pad(b2.astype(jnp.float32).reshape(1, C), ((0, 0), (0, c_pad - C)))
    return (w1p, b1p, w2p, b2p)


def mlp_forward(x, params, *, approximate_gelu=False, tile_m=None, tile_h=None):
    """x: (B, T, C); params: output of prepare_mlp_params.  Returns (B, T, C)."""
    return _mlp_forward(x, *params, approximate_gelu=approximate_gelu,
                        tile_m=tile_m, tile_h=tile_h,
                        vmem_budget=_vmem_budget_bytes())


@functools.partial(
    jax.jit,
    static_argnames=("approximate_gelu", "tile_m", "tile_h", "vmem_budget"))
def _mlp_forward(x, w1p, b1p, w2p, b2p, *, approximate_gelu, tile_m, tile_h,
                 vmem_budget):
    B, T, C = x.shape
    c_pad, h_pad = w1p.shape
    assert c_pad >= C and w2p.shape == (h_pad, c_pad)
    M = B * T

    compute_dtype = w1p.dtype
    out_dtype = x.dtype
    in_item = jnp.dtype(compute_dtype).itemsize
    out_item = jnp.dtype(out_dtype).itemsize
    # f32 outputs double as the accumulator (frees tm*c_pad*4 bytes of VMEM);
    # narrower outputs keep a separate f32 scratch.
    use_acc_scratch = out_dtype != jnp.float32

    # Rows padded only to the 8-sublane boundary (not to tile_m).
    m_pad = _round_up(M, 8)
    tm, th = _choose_tiles(m_pad, c_pad, h_pad, in_item, out_item,
                           use_acc_scratch, vmem_budget, tile_m, tile_h)
    # If everything fits in one row tile, split it in two so the "parallel"
    # row axis can shard across v7x's two TensorCores.
    if tile_m is None and th == h_pad and pl.cdiv(m_pad, tm) == 1 and m_pad >= 16:
        tm = _round_up(pl.cdiv(m_pad, 2), 8)

    grid_m = pl.cdiv(m_pad, tm)
    grid_h = h_pad // th

    x2d = x.reshape(M, C).astype(compute_dtype)
    if m_pad != M or c_pad != C:
        # Zero-padding the channel dim is required (it feeds the contraction);
        # the row padding is at most 7 rows.
        x2d = jnp.pad(x2d, ((0, m_pad - M), (0, c_pad - C)))

    cost = pl.CostEstimate(
        flops=4 * m_pad * c_pad * h_pad,                         # two matmuls
        transcendentals=m_pad * h_pad,                           # one per hidden act
        bytes_accessed=(m_pad * c_pad * (in_item + out_item)     # x in + out
                        + grid_m * 2 * c_pad * h_pad * in_item   # w1+w2 per row tile
                        + (h_pad + c_pad) * 4),                  # biases
    )

    kernel = functools.partial(_mlp_kernel,
                               acc_in_output=not use_acc_scratch,
                               approximate_gelu=approximate_gelu)
    scratch_shapes = ([pltpu.VMEM((tm, c_pad), jnp.float32)]
                      if use_acc_scratch else [])

    out2d = pl.pallas_call(
        kernel,
        out_shape=jax.ShapeDtypeStruct((m_pad, c_pad), out_dtype),
        grid_spec=pltpu.PrefetchScalarGridSpec(
            num_scalar_prefetch=0,
            grid=(grid_m, grid_h),
            in_specs=[
                pl.BlockSpec((tm, c_pad), lambda i, h: (i, 0)),   # x rows
                pl.BlockSpec((c_pad, th), lambda i, h: (0, h)),   # w1 col-block
                pl.BlockSpec((1, th), lambda i, h: (0, h)),       # b1 block
                pl.BlockSpec((th, c_pad), lambda i, h: (h, 0)),   # w2 row-block
                pl.BlockSpec((1, c_pad), lambda i, h: (0, 0)),    # b2 (full)
            ],
            out_specs=pl.BlockSpec((tm, c_pad), lambda i, h: (i, 0)),
            scratch_shapes=scratch_shapes,
        ),
        compiler_params=pltpu.CompilerParams(
            dimension_semantics=("parallel", "arbitrary"),
            vmem_limit_bytes=int(vmem_budget),
        ),
        cost_estimate=cost,
    )(x2d, w1p, b1p, w2p, b2p)

    return out2d[:M, :C].reshape(B, T, C)


def reference_mlp(x, w1, b1, w2, b2):
    h = jnp.einsum("btc,ch->bth", x, w1) + b1
    g = 0.5 * h * (1.0 + jax.lax.erf(h * _INV_SQRT2))
    return jnp.einsum("bth,hc->btc", g, w2) + b2


def _rand_params(key, C, H):
    k1, k2, k3, k4 = jax.random.split(key, 4)
    b1_bound = 1.0 / math.sqrt(C)
    b2_bound = 1.0 / math.sqrt(H)
    w1 = jax.random.uniform(k1, (C, H), minval=-b1_bound, maxval=b1_bound,
                            dtype=jnp.float32)
    b1 = jax.random.uniform(k2, (H,), minval=-b1_bound, maxval=b1_bound,
                            dtype=jnp.float32)
    w2 = jax.random.uniform(k3, (H, C), minval=-b2_bound, maxval=b2_bound,
                            dtype=jnp.float32)
    b2 = jax.random.uniform(k4, (C,), minval=-b2_bound, maxval=b2_bound,
                            dtype=jnp.float32)
    return w1, b1, w2, b2


if __name__ == "__main__":
    # Config: n_embd = 32 -> hidden = 4 * 32 = 128; dropout is identity (eval).
    B, T, C = 2, 8, 32
    H = 4 * C

    key = jax.random.PRNGKey(0)
    kx, kp = jax.random.split(key)
    x = jax.random.normal(kx, (B, T, C), dtype=jnp.float32)
    # Weights stored in the (in, out) layout the kernel consumes (torch weight.T).
    w1, b1, w2, b2 = _rand_params(kp, C, H)
    ref = reference_mlp(x, w1, b1, w2, b2)

    # 1) f32 MXU path, exact-erf GELU: tight parity with the reference.
    params_f32 = prepare_mlp_params(w1, b1, w2, b2, compute_dtype=jnp.float32)
    out = jax.block_until_ready(mlp_forward(x, params_f32))
    assert out.shape == (B, T, C)
    assert jnp.allclose(out, ref, atol=1e-5, rtol=1e-5), "f32 mismatch vs reference"

    # 2) Default performance path: bf16 MXU operands, f32 accumulation.
    params_bf16 = prepare_mlp_params(w1, b1, w2, b2)   # bf16 default
    out_bf16 = jax.block_until_ready(mlp_forward(x, params_bf16))
    assert jnp.allclose(out_bf16, ref, atol=5e-2, rtol=5e-2), "bf16 mismatch"

    # 2b) Optional tanh-GELU (EUP) variant of the performance path.
    out_tanh = jax.block_until_ready(
        mlp_forward(x, params_bf16, approximate_gelu=True))
    assert jnp.allclose(out_tanh, ref, atol=5e-2, rtol=5e-2), "tanh-gelu mismatch"

    # 3) Hidden-dim accumulation path (grid_h > 1) with multiple row tiles.
    C2, H2 = 64, 256
    kx2, kp2 = jax.random.split(jax.random.PRNGKey(1))
    x2 = jax.random.normal(kx2, (B, T, C2), dtype=jnp.float32)
    w1b, b1b, w2b, b2b = _rand_params(kp2, C2, H2)
    ref2 = reference_mlp(x2, w1b, b1b, w2b, b2b)
    params2 = prepare_mlp_params(w1b, b1b, w2b, b2b, compute_dtype=jnp.float32)
    out2 = jax.block_until_ready(mlp_forward(x2, params2, tile_m=8, tile_h=128))
    assert jnp.allclose(out2, ref2, atol=1e-5, rtol=1e-5), "multi-H mismatch"

    # 4) bf16 input/output: exercises the separate f32 accumulator scratch.
    out_b = jax.block_until_ready(mlp_forward(x.astype(jnp.bfloat16), params_bf16))
    assert out_b.dtype == jnp.bfloat16
    assert jnp.allclose(out_b.astype(jnp.float32), ref, atol=1e-1, rtol=1e-1), \
        "bf16-io mismatch"

    print("KERNEL_OK")
</pallas_src>

<mosaic_0001>
module attributes {stable_mosaic.version = 11 : i64} {
  func.func @_mlp_kernel(%arg0: i32, %arg1: i32, %arg2: memref<8x128xf32, #tpu.memory_space<vmem>>, %arg3: memref<128x128xf32, #tpu.memory_space<vmem>>, %arg4: memref<1x128xf32, #tpu.memory_space<vmem>>, %arg5: memref<128x128xf32, #tpu.memory_space<vmem>>, %arg6: memref<1x128xf32, #tpu.memory_space<vmem>>, %arg7: memref<8x128xf32, #tpu.memory_space<vmem>>) attributes {dimension_semantics = [#tpu.dimension_semantics<parallel>, #tpu.dimension_semantics<arbitrary>], iteration_bounds = array<i64: 2, 1>, scalar_prefetch = 0 : i64, scratch_operands = 0 : i64, tpu.core_type = #tpu.core_type<tc>, window_params = [{transform_indices = @transform_0, window_bounds = array<i64: 8, 128>}, {transform_indices = @transform_1, window_bounds = array<i64: 128, 128>}, {transform_indices = @transform_2, window_bounds = array<i64: 1, 128>}, {transform_indices = @transform_3, window_bounds = array<i64: 128, 128>}, {pipeline_mode = #tpu.pipeline_mode<synchronous>, transform_indices = @transform_4, window_bounds = array<i64: 1, 128>}, {transform_indices = @transform_5, window_bounds = array<i64: 8, 128>}]} {
    %c0 = arith.constant 0 : index
    %c0_0 = arith.constant 0 : index
    %0 = vector.load %arg2[%c0, %c0_0] : memref<8x128xf32, #tpu.memory_space<vmem>>, vector<8x128xf32>
    %c0_1 = arith.constant 0 : index
    %c0_2 = arith.constant 0 : index
    %1 = vector.load %arg3[%c0_1, %c0_2] : memref<128x128xf32, #tpu.memory_space<vmem>>, vector<128x128xf32>
    %cst = arith.constant dense<0.000000e+00> : vector<8x128xf32>
    %2 = tpu.matmul %0, %1, %cst {dimension_numbers = #tpu.dot_dimension_numbers<[1], [0], [0], [1], [0, 0, 1, 1], [], []>} : vector<8x128xf32>, vector<128x128xf32>, vector<8x128xf32> -> vector<8x128xf32>
    %c0_3 = arith.constant 0 : index
    %c0_4 = arith.constant 0 : index
    %3 = vector.load %arg4[%c0_3, %c0_4] : memref<1x128xf32, #tpu.memory_space<vmem>>, vector<1x128xf32>
    %4 = vector.broadcast %3 : vector<1x128xf32> to vector<8x128xf32>
    %5 = arith.addf %2, %4 : vector<8x128xf32>
    %cst_5 = arith.constant 5.000000e-01 : f32
    %6 = vector.broadcast %cst_5 : f32 to vector<8x128xf32>
    %7 = arith.mulf %6, %5 : vector<8x128xf32>
    %cst_6 = arith.constant 0.707106769 : f32
    %8 = vector.broadcast %cst_6 : f32 to vector<8x128xf32>
    %9 = arith.mulf %5, %8 : vector<8x128xf32>
    %10 = math.erf %9 : vector<8x128xf32>
    %cst_7 = arith.constant 1.000000e+00 : f32
    %11 = vector.broadcast %cst_7 : f32 to vector<8x128xf32>
    %12 = arith.addf %11, %10 : vector<8x128xf32>
    %13 = arith.mulf %7, %12 : vector<8x128xf32>
    %c0_8 = arith.constant 0 : index
    %c0_9 = arith.constant 0 : index
    %14 = vector.load %arg5[%c0_8, %c0_9] : memref<128x128xf32, #tpu.memory_space<vmem>>, vector<128x128xf32>
    %cst_10 = arith.constant dense<0.000000e+00> : vector<8x128xf32>
    %15 = tpu.matmul %13, %14, %cst_10 {dimension_numbers = #tpu.dot_dimension_numbers<[1], [0], [0], [1], [0, 0, 1, 1], [], []>} : vector<8x128xf32>, vector<128x128xf32>, vector<8x128xf32> -> vector<8x128xf32>
    %c0_i32 = arith.constant 0 : i32
    %16 = arith.cmpi eq, %arg1, %c0_i32 : i32
    %17 = arith.extui %16 : i1 to i32
    %c0_i32_11 = arith.constant 0 : i32
    %18 = arith.cmpi ne, %17, %c0_i32_11 : i32
    scf.if %18 {
      %c0_14 = arith.constant 0 : index
      %c0_15 = arith.constant 0 : index
      %22 = vector.load %arg6[%c0_14, %c0_15] : memref<1x128xf32, #tpu.memory_space<vmem>>, vector<1x128xf32>
      %23 = vector.broadcast %22 : vector<1x128xf32> to vector<8x128xf32>
      %24 = arith.addf %15, %23 : vector<8x128xf32>
      %c0_16 = arith.constant 0 : index
      %c0_17 = arith.constant 0 : index
      %25 = vector.load %arg7[%c0_16, %c0_17] : memref<8x128xf32, #tpu.memory_space<vmem>>, vector<8x128xf32>
      tpu.vector_store %arg7[%c0_16, %c0_17], %24 {strides = array<i32>} : memref<8x128xf32, #tpu.memory_space<vmem>>, vector<8x128xf32>,
    } else {
    }
    %c0_i32_12 = arith.constant 0 : i32
    %19 = arith.cmpi sgt, %arg1, %c0_i32_12 : i32
    %20 = arith.extui %19 : i1 to i32
    %c0_i32_13 = arith.constant 0 : i32
    %21 = arith.cmpi ne, %20, %c0_i32_13 : i32
    scf.if %21 {
      %c0_14 = arith.constant 0 : index
      %c0_15 = arith.constant 0 : index
      %22 = vector.load %arg7[%c0_14, %c0_15] : memref<8x128xf32, #tpu.memory_space<vmem>>, vector<8x128xf32>
      %23 = arith.addf %22, %15 : vector<8x128xf32>
      %c0_16 = arith.constant 0 : index
      %c0_17 = arith.constant 0 : index
      %24 = vector.load %arg7[%c0_16, %c0_17] : memref<8x128xf32, #tpu.memory_space<vmem>>, vector<8x128xf32>
      tpu.vector_store %arg7[%c0_16, %c0_17], %23 {strides = array<i32>} : memref<8x128xf32, #tpu.memory_space<vmem>>, vector<8x128xf32>,
    } else {
    }
    return
  }
  func.func @transform_0(%arg0: i32, %arg1: i32) -> (i32, i32) {
    %c0_i32 = arith.constant 0 : i32
    %c0_i32_0 = arith.constant 0 : i32
    return %arg0, %c0_i32 : i32, i32
  }
  func.func @transform_1(%arg0: i32, %arg1: i32) -> (i32, i32) {
    %c0_i32 = arith.constant 0 : i32
    %c0_i32_0 = arith.constant 0 : i32
    return %c0_i32, %arg1 : i32, i32
  }
  func.func @transform_2(%arg0: i32, %arg1: i32) -> (i32, i32) {
    %c0_i32 = arith.constant 0 : i32
    %c0_i32_0 = arith.constant 0 : i32
    return %c0_i32, %arg1 : i32, i32
  }
  func.func @transform_3(%arg0: i32, %arg1: i32) -> (i32, i32) {
    %c0_i32 = arith.constant 0 : i32
    %c0_i32_0 = arith.constant 0 : i32
    return %arg1, %c0_i32 : i32, i32
  }
  func.func @transform_4(%arg0: i32, %arg1: i32) -> (i32, i32) {
    %c0_i32 = arith.constant 0 : i32
    %c0_i32_0 = arith.constant 0 : i32
    %c0_i32_1 = arith.constant 0 : i32
    return %c0_i32, %c0_i32_0 : i32, i32
  }
  func.func @transform_5(%arg0: i32, %arg1: i32) -> (i32, i32) {
    %c0_i32 = arith.constant 0 : i32
    %c0_i32_0 = arith.constant 0 : i32
    return %arg0, %c0_i32 : i32, i32
  }
}

</mosaic_0001>

<bundles_post_ra>
// kernel: _mlp_forward.1
= control target key start
LH: loop header
LB: loop body
LE: loop exit
PB: predicated region body
PF: predicated region fallthrough
CT: control target
= control target key end

     0   :  { %10 = vsyncpa [#allocation3], 0  ;;  %s1084_s0 = inlined_call_operand.vmem [shape: f32[16,128], index: 0, kind: input, shape index: {}]   ;;  %s1085_s1 = inlined_call_operand.hbm [shape: f32[128,128], index: 1, kind: input, shape index: {}]   ;;  %s1086_s2 = inlined_call_operand.vmem [shape: f32[1,128], index: 2, kind: input, shape index: {}]   ;;  %s1087_s3 = inlined_call_operand.hbm [shape: f32[128,128], index: 3, kind: input, shape index: {}]   ;;  %s1088_s4 = inlined_call_operand.vmem [shape: f32[1,128], index: 4, kind: input, shape index: {}]   ;;  %s1089_s5 = inlined_call_operand.vmem [shape: f32[16,128], index: 5, kind: output, shape index: {}]  }
   0x1   :  { %11 = vsyncpa [#allocation5], 0  ;;  %s942_s18 = smov 0   ;;  %s944_s19 = smov 0  }
   0x2   :  { %s946_s20 = smov 0  }
   0x3 LB: > { %s597_s21 = sadd.s32 4294967295, %s903_s20   ;;  %s29_s22 = sadd.s32 1, %s899_s19  ;;  %s903_s20 = sphi %s946_s20, %s17_s20   ;;  %s899_s19 = sphi %s944_s19, %s1099_s19   ;;  %s895_s18 = sphi %s942_s18, %s1098_s18  }
   0x4   : > { %p31_p0 = scmp.ge.s32.totalorder %s29_s22, 2  ;;  %p599_p1 = scmp.ge.s32.totalorder %s903_s20, 1 }
   0x5   : > { %p185_p2 = scmp.lt.s32.totalorder %s903_s20, 3  ;;  %p967_p4 = scmp.eq.s32.totalorder %s597_s21, 0 }
   0x6   : > { %s1101_s22 = smov (%p31_p0, %s29_s22), 0  ;;  %s905_s25 = smov [#allocation2]  }
   0x7   : > { %p963_p3 = pnand %p599_p1, %p185_p2  ;;  %s199_s26 = sshll.u32 %s905_s25, 4  ;;  %s200_s26 = int_to_ptr.vmem [resolvable:$true] %s199_s26 }
   0x8   : > { %s1094_s24 = scalar_select %p967_p4, 1, 0 }
   0x9   : > { %s1093_s23 = scalar_select %p963_p3, 1, 0 }
   0xa   : > { %p773_p5 = pneg %p963_p3  ;;  %s906_s28 = smov [#allocation4]  }
   0xb   : > { %s221_s29 = sshll.u32 %s906_s28, 4  ;;  %s817_s7 = scalar_lea.hbm %s1085_s1, 2048  ;;  %s979_s29 = int_to_ptr.vmem [resolvable:$true] %s221_s29 }
   0xc   : > { %p975_p6 = pnand %p967_p4, %p773_p5  ;;  %p818_p7 = scmp.ne.s32.totalorder %s1085_s1, %s817_s7 }
   0xd   : > { %p824_p11 = scmp.lt.u32.totalorder %s817_s7, %s1085_s1 }
   0xe   : > { %p819_p8 = pneg %p975_p6 }
  0x10   : > { %p820_p9 = pnand %p819_p8, %p818_p7 }
  0x12   : > { %p821_p10 = pneg %p820_p9 }
  0x14   : > { %p826_p12 = pnand %p824_p11, %p821_p10 }
  0x16   : > { %829 = shalt.err (!%p826_p12)
}
  0x17   : > { %s830_s12 = scalar_lea.vmem %s200_s26, 2048  ;;  %p838_p2 = scmp.lt.s32.totalorder %s200_s26, %s200_s26 }
  0x18   : > { %p831_p13 = scmp.ne.s32.totalorder %s200_s26, %s830_s12  ;;  %p839_p5 = scmp.lt.s32.totalorder %s830_s12, %s830_s12 }
  0x1a   : > { %p833_p0 = pnand %p831_p13, %p819_p8  ;;  %p840_p4 = por %p839_p5, %p838_p2 }
  0x1c   : > { %p834_p1 = pneg %p833_p0 }
  0x1e   : > { %p841_p3 = pnand %p840_p4, %p834_p1 }
  0x20   : > { %844 = shalt.err (!%p841_p3)
}
  0x21   : > { %s907_s13 = smov 128   ;;  %s908_s14 = smov 8  }
  0x22   : > { %776 = dma.hbm_to_vmem [thread:$0]  (!%p975_p6), %s1085_s1, 2048, %s200_s26, [#allocation3], %s907_s13, %s907_s13, %s908_s14  }
  0x23   : > { %s845_s25 = scalar_lea.hbm %s1087_s3, 2048 }
  0x24   : > { %p846_p7 = scmp.ne.s32.totalorder %s1087_s3, %s845_s25  ;;  %p852_p9 = scmp.lt.u32.totalorder %s845_s25, %s1087_s3 }
  0x26   : > { %p848_p3 = pnand %p846_p7, %p819_p8 }
  0x28   : > { %p849_p4 = pneg %p848_p3 }
  0x2a   : > { %p854_p10 = pnand %p852_p9, %p849_p4 }
  0x2c   : > { %857 = shalt.err (!%p854_p10)
}
  0x2d   : > { %s858_s26 = scalar_lea.vmem %s979_s29, 2048  ;;  %p866_p0 = scmp.lt.s32.totalorder %s979_s29, %s979_s29 }
  0x2e   : > { %p859_p11 = scmp.ne.s32.totalorder %s979_s29, %s858_s26  ;;  %p867_p1 = scmp.lt.s32.totalorder %s858_s26, %s858_s26 }
  0x30   : > { %p861_p12 = pnand %p859_p11, %p819_p8  ;;  %p868_p2 = por %p867_p1, %p866_p0 }
  0x32   : > { %p862_p13 = pneg %p861_p12 }
  0x34   : > { %p869_p5 = pnand %p868_p2, %p862_p13 }
  0x36   : > { %872 = shalt.err (!%p869_p5)
}
  0x37   : > { %779 = dma.hbm_to_vmem [thread:$0]  (!%p975_p6), %s1087_s3, 2048, %s979_s29, [#allocation5], %s907_s13, %s907_s13, %s908_s14  }
  0x38   : > { %p1096_p7 = scmp.ne.s32.totalorder %s1093_s23, 0 }
  0x39   : > { %p1097_p3 = scmp.ne.s32.totalorder (!%p1096_p7), %s1094_s24, 0 }
  0x3a   : > { %247 = sbr.rel (%p1096_p7) target bundleno = 549 (0x225), region = 40 }
  0x41   : > { %886 = dma.done.wait (%p1097_p3), [#allocation3], 2048  }
  0x42   : > { %888 = vsyncadd (%p1097_p3), [#allocation3], 4294965248 }
  0x43   : > { %890 = dma.done.wait (%p1097_p3), [#allocation5], 2048  }
  0x44   : > { %892 = vsyncadd (%p1097_p3), [#allocation5], 4294965248  ;;  %v909_v0 = vmov 0.0|0.0   ;;  %vm910_vm0 = vmmov 0   ;;  %v911_v1 = vmov 0.0   ;;  %v293_v2 = vld [vmem:[#allocation2] sm:$0xff] }
  0x45   : > { %717 = vmatprep.subr.bf16.mxu0 %v909_v0  ;;  %679 = vmatprep.mubr.msk.f32.mxu0 %vm910_vm0, %v911_v1  ;;  %v294_v3 = vld [vmem:[#allocation2 + $0x8] sm:$0xff]  ;;  %v295_v4 = vld [vmem:[#allocation2 + $0x10] sm:$0xff]  ;;  %v296_v6 = vld [vmem:[#allocation2 + $0x18] sm:$0xff]  ;;  %p280_p6 = scmp.lt.s32.totalorder %s895_s18, 1 }
  0x46   : > { %741 = vmatprep.subr.bf16.mxu1 %v909_v0  ;;  %714 = vmatprep.mubr.msk.f32.mxu1 %vm910_vm0, %v911_v1  ;;  %v718_v5 = vpack.c.bf16 %v294_v3, %v293_v2  ;;  %v721_v7 = vpack.c.bf16 %v296_v6, %v295_v4  ;;  %v297_v8 = vld [vmem:[#allocation2 + $0x20] sm:$0xff]  ;;  %v298_v9 = vld [vmem:[#allocation2 + $0x28] sm:$0xff]  ;;  %v393_v12 = vld [vmem:[#allocation4 + $0x10] sm:$0xff] }
  0x47   : > { %v391_v10 = vld [vmem:[#allocation4] sm:$0xff]  ;;  %v392_v11 = vld [vmem:[#allocation4 + $0x8] sm:$0xff]  ;;  %v394_v13 = vld [vmem:[#allocation4 + $0x18] sm:$0xff]  ;;  %v724_v14 = vpack.c.bf16 %v298_v9, %v297_v8  ;;  %s1103_s18 = smov (!%p280_p6, %s895_s18), 1 }
  0x48   : > { %719 = vmatpush3.bf16.msra.mxu0 %v718_v5  ;;  %v742_v15 = vpack.c.bf16 %v392_v11, %v391_v10  ;;  %v299_v16 = vld [vmem:[#allocation2 + $0x30] sm:$0xff]  ;;  %v300_v17 = vld [vmem:[#allocation2 + $0x38] sm:$0xff]  ;;  %v745_v18 = vpack.c.bf16 %v394_v13, %v393_v12  ;;  %v395_v19 = vld [vmem:[#allocation4 + $0x20] sm:$0xff]  ;;  %s607_s23 = sshll.u32 %s1103_s18, 3 }
  0x49   : > { %720 = vmatprep.subr.bf16.mxu0 %v909_v0  ;;  %v396_v20 = vld [vmem:[#allocation4 + $0x28] sm:$0xff]  ;;  %v727_v21 = vpack.c.bf16 %v300_v17, %v299_v16  ;;  %v301_v22 = vld [vmem:[#allocation2 + $0x40] sm:$0xff]  ;;  %v303_v26 = vld [vmem:[#allocation2 + $0x50] sm:$0xff]  ;;  %s283_s29 = scalar_lea.vmem %s1084_s0, %s607_s23  ;;  %s291_s16 = scalar_lea.vmem %s1089_s5, %s607_s23 }
  0x4a   : > { %743 = vmatpush3.bf16.msra.mxu1 %v742_v15  ;;  %v302_v23 = vld [vmem:[#allocation2 + $0x48] sm:$0xff]  ;;  %v748_v24 = vpack.c.bf16 %v396_v20, %v395_v19  ;;  %v304_v27 = vld [vmem:[#allocation2 + $0x58] sm:$0xff]  ;;  %v305_v29 = vld [vmem:[#allocation2 + $0x60] sm:$0xff] }
  0x4b   : > { %744 = vmatprep.subr.bf16.mxu1 %v909_v0  ;;  %v730_v25 = vpack.c.bf16 %v302_v23, %v301_v22  ;;  %v733_v28 = vpack.c.bf16 %v304_v27, %v303_v26  ;;  %v306_v30 = vld [vmem:[#allocation2 + $0x68] sm:$0xff]  ;;  %v307_v32 = vld [vmem:[#allocation2 + $0x70] sm:$0xff]  ;;  %v308_v33 = vld [vmem:[#allocation2 + $0x78] sm:$0xff] }
  0x4c   : > { %722 = vmatpush3.bf16.msra.mxu0 %v721_v7  ;;  %v736_v31 = vpack.c.bf16 %v306_v30, %v305_v29  ;;  %v739_v34 = vpack.c.bf16 %v308_v33, %v307_v32  ;;  %v292_v35 = vld [vmem:[%s283_s29] sm:$0xff]  ;;  %v397_v36 = vld [vmem:[#allocation4 + $0x30] sm:$0xff]  ;;  %v398_v37 = vld [vmem:[#allocation4 + $0x38] sm:$0xff] }
  0x4d   : > { %723 = vmatprep.subr.bf16.mxu0 %v909_v0  ;;  %v751_v38 = vpack.c.bf16 %v398_v37, %v397_v36  ;;  %v399_v39 = vld [vmem:[#allocation4 + $0x40] sm:$0xff]  ;;  %v400_v40 = vld [vmem:[#allocation4 + $0x48] sm:$0xff]  ;;  %v401_v42 = vld [vmem:[#allocation4 + $0x50] sm:$0xff] }
  0x4e   : > { %746 = vmatpush3.bf16.msra.mxu1 %v745_v18  ;;  %v754_v41 = vpack.c.bf16 %v400_v40, %v399_v39  ;;  %v402_v43 = vld [vmem:[#allocation4 + $0x58] sm:$0xff]  ;;  %v403_v45 = vld [vmem:[#allocation4 + $0x60] sm:$0xff]  ;;  %v404_v46 = vld [vmem:[#allocation4 + $0x68] sm:$0xff] }
  0x4f   : > { %747 = vmatprep.subr.bf16.mxu1 %v909_v0  ;;  %v757_v44 = vpack.c.bf16 %v402_v43, %v401_v42  ;;  %v760_v47 = vpack.c.bf16 %v404_v46, %v403_v45  ;;  %v405_v48 = vld [vmem:[#allocation4 + $0x70] sm:$0xff]  ;;  %v406_v49 = vld [vmem:[#allocation4 + $0x78] sm:$0xff]  ;;  %v609_v51 = vld [vmem:[%s1086_s2] ss:$0 sm:$0xff] }
  0x50   : > { %725 = vmatpush3.bf16.msra.mxu0 %v724_v14  ;;  %v763_v50 = vpack.c.bf16 %v406_v49, %v405_v48  ;;  %v610_v60 = vld [vmem:[%s1088_s4] ss:$0 sm:$0xff] }
  0x51   : > { %726 = vmatprep.subr.bf16.mxu0 %v909_v0 }
  0x52   : > { %749 = vmatpush3.bf16.msra.mxu1 %v748_v24 }
  0x53   : > { %750 = vmatprep.subr.bf16.mxu1 %v909_v0 }
  0x54   : > { %728 = vmatpush3.bf16.msra.mxu0 %v727_v21 }
  0x55   : > { %729 = vmatprep.subr.bf16.mxu0 %v909_v0 }
  0x56   : > { %752 = vmatpush3.bf16.msra.mxu1 %v751_v38 }
  0x57   : > { %753 = vmatprep.subr.bf16.mxu1 %v909_v0 }
  0x58   : > { %731 = vmatpush3.bf16.msra.mxu0 %v730_v25 }
  0x59   : > { %732 = vmatprep.subr.bf16.mxu0 %v909_v0 }
  0x5a   : > { %755 = vmatpush3.bf16.msra.mxu1 %v754_v41 }
  0x5b   : > { %756 = vmatprep.subr.bf16.mxu1 %v909_v0 }
  0x5c   : > { %734 = vmatpush3.bf16.msra.mxu0 %v733_v28 }
  0x5d   : > { %735 = vmatprep.subr.bf16.mxu0 %v909_v0 }
  0x5e   : > { %758 = vmatpush3.bf16.msra.mxu1 %v757_v44 }
  0x5f   : > { %759 = vmatprep.subr.bf16.mxu1 %v909_v0 }
  0x60   : > { %737 = vmatpush3.bf16.msra.mxu0 %v736_v31 }
  0x61   : > { %738 = vmatprep.subr.bf16.mxu0 %v909_v0 }
  0x62   : > { %761 = vmatpush3.bf16.msra.mxu1 %v760_v47 }
  0x63   : > { %762 = vmatprep.subr.bf16.mxu1 %v909_v0 }
  0x64   : > { %740 = vmatpush3.bf16.msra.mxu0 %v739_v34 }
  0x66   : > { %764 = vmatpush3.bf16.msra.mxu1 %v763_v50 }
  0x67   : > { %680 = vmatmul.mubr.f32.vlgmr.msra.gmra.mrb[0].mxu0 %v292_v35 }
 0x13a   : > { %v382_v52 = vpop.f32.mrb[0].mxu0 }
 0x13b   : > { %v383_v53 = vadd.f32 %v609_v51, %v382_v52  ;;  %v681_v54 = vpop.f32.mrb[1].mxu0 }
 0x13d   : > { %v387_v55 = vmul.f32 0.70710677, %v383_v53  ;;  %v386_v57 = vmul.f32 0.5, %v383_v53 }
 0x13f   : > { %815 = verf.f32 %v387_v55 }
 0x149   : > { %v816_v56 = vpop.eup %815 }
 0x14a   : > { %v389_v58 = vadd.f32 1.0, %v816_v56 }
 0x14c   : > { %v390_v59 = vmul.f32 %v389_v58, %v386_v57 }
 0x14e   : > { %715 = vmatmul.mubr.f32.vlgmr.msra.gmra.mrb[0].mxu1 %v390_v59 }
 0x221   : > { %v473_v61 = vpop.f32.mrb[0].mxu1 }
 0x222   : > { %v488_v62 = vadd.f32 %v610_v60, %v473_v61  ;;  %v716_v63 = vpop.f32.mrb[1].mxu1 }
 0x224   : > { %489 = vst [vmem:[%s291_s16] sm:$0xff] %v488_v62 }
 0x225 PF: > { %s17_s20 = sadd.s32 1, %s903_s20   ;;  %s1098_s18 = smov %s899_s19 }
 0x226   : > { %p14_p8 = scmp.ge.s32.totalorder %s17_s20, 4   ;;  %s1099_s19 = smov %s1101_s22 }
 0x228   :  { %16 = sbr.rel (!%p14_p8) target bundleno = 3 (0x3), region = 92 }
 0x22f   :  { %516 = vsyncpa [#allocation3], 1 }
 0x230   :  { %518 = vsyncpa [#allocation3 + $0x1], 1 }
 0x231   :  { %519 = vsyncpa [#allocation5], 1 }

</bundles_post_ra>
